<compile_context>
chip_gen: v7x
topology: tpu7x:2x2x1
jax: 0.10.0
libtpu: 0.0.40
codegen_flags: <defaults>
</compile_context>

<pallas_src>
import jax
import jax.numpy as jnp
from jax.experimental import pallas as pl
from jax.experimental.pallas import tpu as pltpu


# ----------------------------------------------------------------------------- kernels
def _scse_fused_kernel(x_ref, w1_ref, b1_ref, w2t_ref, b2_ref, ws_ref, bs_ref,
                       o_ref):
    """Fully fused SCSE for one sample: x_ref/o_ref are (1, C, HW)."""
    x = x_ref[0]                                   # (C, HW), activation dtype
    hw = x.shape[1]
    inv_hw = 1.0 / hw

    # --- cSE gate, fully in-kernel (no extra HBM pass over x for the mean).
    # f32-accumulated global average pool; for f32 inputs the dtype arg is a no-op.
    mean = jnp.sum(x, axis=1, keepdims=True, dtype=jnp.float32) * inv_hw   # (C, 1)

    # Tiny 1x1-conv MLP kept column/row shaped so no transposes or 1-wide
    # matmuls are needed: pure VPU broadcasts + XLU reduces on (C, Cr) tiles.
    h = jnp.maximum(
        jnp.sum(w1_ref[...] * mean, axis=0, keepdims=True) + b1_ref[...], 0.0)   # (1, Cr)
    cse = jax.nn.sigmoid(
        jnp.sum(w2t_ref[...] * h, axis=1, keepdims=True) + b2_ref[...])          # (C, 1)

    # --- sSE: per-pixel channel reduce as a lane-dense (1,C)@(C,HW) MXU matmul
    # (f32 accumulation), sigmoid on the (1,HW) row goes to the EUP (free slot).
    s = jnp.dot(ws_ref[...], x, preferred_element_type=jnp.float32) + bs_ref[0]
    sse = jax.nn.sigmoid(s)                                                       # (1, HW)

    # --- x*cSE + x*sSE == x*(cSE+sSE).  Gate is built in the activation dtype:
    # bf16 VALU combine on v6e/v7x (half the vreg pressure); no-op casts for f32.
    gate = cse.astype(x.dtype) + sse.astype(x.dtype)                              # (C, HW)
    o_ref[0] = (x * gate).astype(o_ref.dtype)


def _scse_combine_kernel(x_ref, cse_ref, ws_ref, bs_ref, o_ref):
    """Two-pass fallback: sSE + combine for one (C, T) tile; cSE gate precomputed."""
    x = x_ref[0]                                                                  # (C, T)
    s = jnp.dot(ws_ref[...], x, preferred_element_type=jnp.float32) + bs_ref[0]
    sse = jax.nn.sigmoid(s)                                                       # (1, T)
    gate = cse_ref[0].astype(x.dtype) + sse.astype(x.dtype)                       # (C, T)
    o_ref[0] = (x * gate).astype(o_ref.dtype)


# ----------------------------------------------------------------------------- sizing
def _vmem_budget_bytes():
    """Device-aware VMEM budget: ~3/4 of physical, capped at 96 MiB.

    v5e/v6e (128 MiB physical) -> 96 MiB; v7x (64 MiB) -> 48 MiB.
    """
    try:
        cap = pltpu.get_tpu_info().vmem_capacity_bytes
    except Exception:
        cap = 64 * 1024 * 1024            # conservative (v7x-sized) fallback
    return min((cap * 3) // 4, 96 * 1024 * 1024)


def _plan_hw_tiling(hw, c, dtype_bytes, budget_bytes):
    """Return (T, num_blocks, hw_padded) for the two-pass tiled path.

    Budget model per element: double-buffered input + output plus ~f32 temps.
    """
    per_elem = 4 * dtype_bytes + 8
    max_t = budget_bytes // max(per_elem * c, 1)
    max_t = max((max_t // 128) * 128, 128)
    if hw <= max_t:
        return hw, 1, hw                  # single full-HW block per sample
    if hw % 128 == 0:
        # Largest multiple of 128 <= max_t that divides HW; refuse to crawl at
        # tiny overhead-dominated tiles (< 512 lanes).
        t = min(max_t, hw)
        while t >= 512 and hw % t != 0:
            t -= 128
        if t >= 512 and hw % t == 0:
            return t, hw // t, hw
    # Awkward / non-aligned HW that does not fit as one block: use a large
    # lane-dense tile and pad the tail (one extra HBM pass, still beats T=128
    # or blowing the VMEM budget with a full-HW block).
    t = max_t
    n = -(-hw // t)
    return t, n, t * n


# ----------------------------------------------------------------------------- wrappers
def _scse_fused(x_flat, w1, b1, w2, b2, ws_row, bs_s, vmem_limit):
    N, C, HW = x_flat.shape
    cr = w1.shape[1]
    w1_f = w1.astype(jnp.float32)                       # (C, Cr)
    b1_r = b1.reshape(1, cr).astype(jnp.float32)        # (1, Cr)
    w2t = w2.T.astype(jnp.float32)                      # (C, Cr)
    b2_c = b2.reshape(C, 1).astype(jnp.float32)         # (C, 1)

    return pl.pallas_call(
        _scse_fused_kernel,
        out_shape=jax.ShapeDtypeStruct((N, C, HW), x_flat.dtype),
        grid_spec=pltpu.PrefetchScalarGridSpec(
            num_scalar_prefetch=0,
            grid=(N,),
            in_specs=[
                pl.BlockSpec((1, C, HW), lambda n: (n, 0, 0)),      # x slab
                pl.BlockSpec((C, cr), lambda n: (0, 0)),            # W1
                pl.BlockSpec((1, cr), lambda n: (0, 0)),            # b1
                pl.BlockSpec((C, cr), lambda n: (0, 0)),            # W2^T
                pl.BlockSpec((C, 1), lambda n: (0, 0)),             # b2
                pl.BlockSpec((1, C), lambda n: (0, 0)),             # sSE weight row
                pl.BlockSpec(memory_space=pltpu.MemorySpace.SMEM),  # sSE bias scalar
            ],
            out_specs=pl.BlockSpec((1, C, HW), lambda n: (n, 0, 0)),
        ),
        compiler_params=pltpu.CompilerParams(
            dimension_semantics=("parallel",),          # shards samples across TCs
            vmem_limit_bytes=vmem_limit,
        ),
    )(x_flat, w1_f, b1_r, w2t, b2_c, ws_row, bs_s)


def _scse_two_pass(x_flat, w1, b1, w2, b2, ws_row, bs_s, tile_budget, vmem_limit):
    N, C, HW = x_flat.shape
    dtype = x_flat.dtype

    # cSE gate hoisted (tiny FLOPs).  Costs one extra HBM read of x, which is
    # exactly why the fused path is preferred whenever the slab fits VMEM.
    mean = jnp.mean(x_flat.astype(jnp.float32), axis=2)             # (N, C)
    h = jnp.maximum(mean @ w1 + b1, 0.0)
    cse = jax.nn.sigmoid(h @ w2 + b2)[:, :, None].astype(jnp.float32)   # (N, C, 1)

    T, n_t, hw_pad = _plan_hw_tiling(HW, C, jnp.dtype(dtype).itemsize, tile_budget)
    xk = x_flat
    if hw_pad != HW:
        # Rare path (huge non-128-aligned HW): pad so every block stays
        # lane-dense and inside the VMEM budget; sliced off below.
        xk = jnp.pad(x_flat, ((0, 0), (0, 0), (0, hw_pad - HW)))

    # TODO(synk): if C ever gets so large that even T=128 exceeds the VMEM
    # budget, tile C with an sSE partial-sum accumulator.
    out = pl.pallas_call(
        _scse_combine_kernel,
        out_shape=jax.ShapeDtypeStruct((N, C, hw_pad), dtype),
        grid_spec=pltpu.PrefetchScalarGridSpec(
            num_scalar_prefetch=0,
            grid=(N, n_t),
            in_specs=[
                pl.BlockSpec((1, C, T), lambda n, t: (n, 0, t)),    # x tile
                pl.BlockSpec((1, C, 1), lambda n, t: (n, 0, 0)),    # cSE gate
                pl.BlockSpec((1, C), lambda n, t: (0, 0)),          # sSE weight row
                pl.BlockSpec(memory_space=pltpu.MemorySpace.SMEM),  # sSE bias scalar
            ],
            out_specs=pl.BlockSpec((1, C, T), lambda n, t: (n, 0, t)),
        ),
        compiler_params=pltpu.CompilerParams(
            dimension_semantics=("parallel", "parallel"),
            vmem_limit_bytes=vmem_limit,
        ),
    )(xk, cse, ws_row, bs_s)
    if hw_pad != HW:
        out = out[:, :, :HW]
    return out


def scse_forward(x_nchw, params, *, force_two_pass=False, tile_budget_bytes=None):
    """x_nchw: (N, C, H, W) float32 or bfloat16. Returns same shape/dtype."""
    w1, b1, w2, b2, ws, bs = params
    N, C, H, W = x_nchw.shape
    HW = H * W
    dtype = x_nchw.dtype
    dtype_bytes = jnp.dtype(dtype).itemsize

    dev_budget = _vmem_budget_bytes()
    budget = min(tile_budget_bytes, dev_budget) if tile_budget_bytes else dev_budget

    x_flat = x_nchw.reshape(N, C, HW)                   # free reshape, no data movement
    ws_row = ws.reshape(1, C).astype(dtype)             # sSE weight in activation dtype
    bs_s = bs.reshape(1).astype(jnp.float32)            # sSE bias scalar (SMEM)

    # Single-pass fused kernel iff the per-sample slab (double-buffered in+out
    # plus f32 gate temporaries) fits the device VMEM budget.
    fused_bytes = (4 * dtype_bytes + 8) * C * HW
    if (not force_two_pass) and fused_bytes <= budget:
        out = _scse_fused(x_flat, w1, b1, w2, b2, ws_row, bs_s, dev_budget)
    else:
        out = _scse_two_pass(x_flat, w1, b1, w2, b2, ws_row, bs_s, budget, dev_budget)
    return out.reshape(N, C, H, W)


# ----------------------------------------------------------------------------- reference
def init_params(key, in_channels, reduction=16):
    """Synthetic parameters matching SCSEModule's layer shapes (matmul form)."""
    cr = max(in_channels // reduction, 1)
    k1, k2, k3, k4, k5, k6 = jax.random.split(key, 6)
    w1 = jax.random.normal(k1, (in_channels, cr), jnp.float32) * 0.1
    b1 = jax.random.normal(k2, (cr,), jnp.float32) * 0.1
    w2 = jax.random.normal(k3, (cr, in_channels), jnp.float32) * 0.1
    b2 = jax.random.normal(k4, (in_channels,), jnp.float32) * 0.1
    ws = jax.random.normal(k5, (in_channels,), jnp.float32) * 0.1
    bs = jax.random.normal(k6, (1,), jnp.float32) * 0.1
    return (w1, b1, w2, b2, ws, bs)


def scse_reference(x_nchw, params):
    """Plain-JAX reference mirroring the PyTorch forward."""
    w1, b1, w2, b2, ws, bs = params
    x = x_nchw.astype(jnp.float32)
    N, C, H, W = x.shape
    mean = jnp.mean(x, axis=(2, 3))                                  # (N, C)
    h = jnp.maximum(mean @ w1 + b1, 0.0)
    cse = jax.nn.sigmoid(h @ w2 + b2)[:, :, None, None]              # (N, C, 1, 1)
    sse = jax.nn.sigmoid(
        jnp.einsum("nchw,c->nhw", x, ws.reshape(C)) + bs.reshape(())
    )[:, None, :, :]                                                 # (N, 1, H, W)
    return x * cse + x * sse


if __name__ == "__main__":
    N, C, H, W = 2, 32, 16, 16
    reduction = 16

    key = jax.random.PRNGKey(0)
    kx, kp = jax.random.split(key)
    x = jax.random.normal(kx, (N, C, H, W), jnp.float32)
    params = init_params(kp, C, reduction)
    ref = scse_reference(x, params)

    # 1) Fully-fused single-pass path (per-sample slab resident in VMEM).
    out = jax.block_until_ready(scse_forward(x, params))
    assert out.shape == (N, C, H, W) and out.dtype == x.dtype
    assert jnp.allclose(out, ref, atol=1e-4, rtol=1e-4)

    # 2) Two-pass tiled fallback: tiny tile budget forces an HW-tiled grid
    #    (T=128, two tiles per sample), exercising the tiled index maps.
    out2 = jax.block_until_ready(
        scse_forward(x, params, force_two_pass=True, tile_budget_bytes=128 * 1024))
    assert jnp.allclose(out2, ref, atol=1e-4, rtol=1e-4)

    # 3) bf16 activations through the fused path (half the HBM traffic).
    x_bf16 = x.astype(jnp.bfloat16)
    ref_bf16 = scse_reference(x_bf16.astype(jnp.float32), params)
    out3 = jax.block_until_ready(scse_forward(x_bf16, params))
    assert out3.dtype == jnp.bfloat16
    assert jnp.allclose(out3.astype(jnp.float32), ref_bf16, atol=5e-2, rtol=5e-2)

    # 4) bf16 through the two-pass fallback.
    out4 = jax.block_until_ready(
        scse_forward(x_bf16, params, force_two_pass=True,
                     tile_budget_bytes=128 * 1024))
    assert jnp.allclose(out4.astype(jnp.float32), ref_bf16, atol=5e-2, rtol=5e-2)

    print("KERNEL_OK")
</pallas_src>

<mosaic_0001>
module attributes {stable_mosaic.version = 11 : i64} {
  func.func @_scse_fused_kernel(%arg0: i32, %arg1: memref<1x32x256xf32, #tpu.memory_space<vmem>>, %arg2: memref<32x2xf32, #tpu.memory_space<vmem>>, %arg3: memref<1x2xf32, #tpu.memory_space<vmem>>, %arg4: memref<32x2xf32, #tpu.memory_space<vmem>>, %arg5: memref<32x1xf32, #tpu.memory_space<vmem>>, %arg6: memref<1x32xf32, #tpu.memory_space<vmem>>, %arg7: memref<1xf32, #tpu.memory_space<smem>>, %arg8: memref<1x32x256xf32, #tpu.memory_space<vmem>>) attributes {dimension_semantics = [#tpu.dimension_semantics<parallel>], iteration_bounds = array<i64: 2>, scalar_prefetch = 0 : i64, scratch_operands = 0 : i64, tpu.core_type = #tpu.core_type<tc>, window_params = [{transform_indices = @transform_0, window_bounds = array<i64: 1, 32, 256>}, {pipeline_mode = #tpu.pipeline_mode<synchronous>, transform_indices = @transform_1, window_bounds = array<i64: 32, 2>}, {pipeline_mode = #tpu.pipeline_mode<synchronous>, transform_indices = @transform_2, window_bounds = array<i64: 1, 2>}, {pipeline_mode = #tpu.pipeline_mode<synchronous>, transform_indices = @transform_3, window_bounds = array<i64: 32, 2>}, {pipeline_mode = #tpu.pipeline_mode<synchronous>, transform_indices = @transform_4, window_bounds = array<i64: 32, 1>}, {pipeline_mode = #tpu.pipeline_mode<synchronous>, transform_indices = @transform_5, window_bounds = array<i64: 1, 32>}, {transform_indices = @transform_6, window_bounds = array<i64: 1>}, {transform_indices = @transform_7, window_bounds = array<i64: 1, 32, 256>}]} {
    %c0 = arith.constant 0 : index
    %c0_0 = arith.constant 0 : index
    %c0_1 = arith.constant 0 : index
    %0 = vector.load %arg1[%c0, %c0_0, %c0_1] : memref<1x32x256xf32, #tpu.memory_space<vmem>>, vector<1x32x256xf32>
    %1 = vector.shape_cast %0 : vector<1x32x256xf32> to vector<32x256xf32>
    %cst = arith.constant dense<0.000000e+00> : vector<32xf32>
    %2 = vector.multi_reduction <add>, %1, %cst [1] : vector<32x256xf32> to vector<32xf32>
    %3 = vector.shape_cast %2 : vector<32xf32> to vector<32x1xf32>
    %cst_2 = arith.constant 3.906250e-03 : f32
    %4 = vector.broadcast %cst_2 : f32 to vector<32x1xf32>
    %5 = arith.mulf %3, %4 : vector<32x1xf32>
    %c0_3 = arith.constant 0 : index
    %c0_4 = arith.constant 0 : index
    %6 = vector.load %arg2[%c0_3, %c0_4] : memref<32x2xf32, #tpu.memory_space<vmem>>, vector<32x2xf32>
    %7 = vector.broadcast %5 : vector<32x1xf32> to vector<32x2xf32>
    %8 = arith.mulf %6, %7 : vector<32x2xf32>
    %cst_5 = arith.constant dense<0.000000e+00> : vector<2xf32>
    %9 = vector.multi_reduction <add>, %8, %cst_5 [0] : vector<32x2xf32> to vector<2xf32>
    %10 = vector.shape_cast %9 : vector<2xf32> to vector<1x2xf32>
    %c0_6 = arith.constant 0 : index
    %c0_7 = arith.constant 0 : index
    %11 = vector.load %arg3[%c0_6, %c0_7] : memref<1x2xf32, #tpu.memory_space<vmem>>, vector<1x2xf32>
    %12 = arith.addf %10, %11 : vector<1x2xf32>
    %cst_8 = arith.constant 0.000000e+00 : f32
    %13 = vector.broadcast %cst_8 : f32 to vector<1x2xf32>
    %14 = arith.maximumf %12, %13 : vector<1x2xf32>
    %c0_9 = arith.constant 0 : index
    %c0_10 = arith.constant 0 : index
    %15 = vector.load %arg4[%c0_9, %c0_10] : memref<32x2xf32, #tpu.memory_space<vmem>>, vector<32x2xf32>
    %16 = vector.broadcast %14 : vector<1x2xf32> to vector<32x2xf32>
    %17 = arith.mulf %15, %16 : vector<32x2xf32>
    %cst_11 = arith.constant dense<0.000000e+00> : vector<32xf32>
    %18 = vector.multi_reduction <add>, %17, %cst_11 [1] : vector<32x2xf32> to vector<32xf32>
    %19 = vector.shape_cast %18 : vector<32xf32> to vector<32x1xf32>
    %c0_12 = arith.constant 0 : index
    %c0_13 = arith.constant 0 : index
    %20 = vector.load %arg5[%c0_12, %c0_13] : memref<32x1xf32, #tpu.memory_space<vmem>>, vector<32x1xf32>
    %21 = arith.addf %19, %20 : vector<32x1xf32>
    %22 = arith.negf %21 : vector<32x1xf32>
    %23 = math.exp %22 : vector<32x1xf32>
    %cst_14 = arith.constant 1.000000e+00 : f32
    %24 = vector.broadcast %cst_14 : f32 to vector<32x1xf32>
    %25 = arith.addf %24, %23 : vector<32x1xf32>
    %26 = arith.divf %24, %25 : vector<32x1xf32>
    %c0_15 = arith.constant 0 : index
    %c0_16 = arith.constant 0 : index
    %27 = vector.load %arg6[%c0_15, %c0_16] : memref<1x32xf32, #tpu.memory_space<vmem>>, vector<1x32xf32>
    %cst_17 = arith.constant dense<0.000000e+00> : vector<1x256xf32>
    %28 = tpu.matmul %27, %1, %cst_17 {dimension_numbers = #tpu.dot_dimension_numbers<[1], [0], [0], [1], [0, 0, 1, 1], [], []>} : vector<1x32xf32>, vector<32x256xf32>, vector<1x256xf32> -> vector<1x256xf32>
    %c0_18 = arith.constant 0 : index
    %29 = memref.load %arg7[%c0_18] : memref<1xf32, #tpu.memory_space<smem>>
    %30 = vector.broadcast %29 : f32 to vector<1x256xf32>
    %31 = arith.addf %28, %30 : vector<1x256xf32>
    %32 = arith.negf %31 : vector<1x256xf32>
    %33 = math.exp %32 : vector<1x256xf32>
    %cst_19 = arith.constant 1.000000e+00 : f32
    %34 = vector.broadcast %cst_19 : f32 to vector<1x256xf32>
    %35 = arith.addf %34, %33 : vector<1x256xf32>
    %36 = arith.divf %34, %35 : vector<1x256xf32>
    %37 = vector.broadcast %26 : vector<32x1xf32> to vector<32x256xf32>
    %38 = vector.broadcast %36 : vector<1x256xf32> to vector<32x256xf32>
    %39 = arith.addf %37, %38 : vector<32x256xf32>
    %40 = arith.mulf %1, %39 : vector<32x256xf32>
    %c0_20 = arith.constant 0 : index
    %c0_21 = arith.constant 0 : index
    %c0_22 = arith.constant 0 : index
    %41 = vector.load %arg8[%c0_20, %c0_21, %c0_22] : memref<1x32x256xf32, #tpu.memory_space<vmem>>, vector<1x32x256xf32>
    %42 = vector.shape_cast %41 : vector<1x32x256xf32> to vector<32x256xf32>
    %43 = vector.shape_cast %40 : vector<32x256xf32> to vector<1x32x256xf32>
    tpu.vector_store %arg8[%c0_20, %c0_21, %c0_22], %43 {strides = array<i32>} : memref<1x32x256xf32, #tpu.memory_space<vmem>>, vector<1x32x256xf32>,
    return
  }
  func.func @transform_0(%arg0: i32) -> (i32, i32, i32) {
    %c0_i32 = arith.constant 0 : i32
    %c0_i32_0 = arith.constant 0 : i32
    %c0_i32_1 = arith.constant 0 : i32
    return %arg0, %c0_i32, %c0_i32_0 : i32, i32, i32
  }
  func.func @transform_1(%arg0: i32) -> (i32, i32) {
    %c0_i32 = arith.constant 0 : i32
    %c0_i32_0 = arith.constant 0 : i32
    %c0_i32_1 = arith.constant 0 : i32
    return %c0_i32, %c0_i32_0 : i32, i32
  }
  func.func @transform_2(%arg0: i32) -> (i32, i32) {
    %c0_i32 = arith.constant 0 : i32
    %c0_i32_0 = arith.constant 0 : i32
    %c0_i32_1 = arith.constant 0 : i32
    return %c0_i32, %c0_i32_0 : i32, i32
  }
  func.func @transform_3(%arg0: i32) -> (i32, i32) {
    %c0_i32 = arith.constant 0 : i32
    %c0_i32_0 = arith.constant 0 : i32
    %c0_i32_1 = arith.constant 0 : i32
    return %c0_i32, %c0_i32_0 : i32, i32
  }
  func.func @transform_4(%arg0: i32) -> (i32, i32) {
    %c0_i32 = arith.constant 0 : i32
    %c0_i32_0 = arith.constant 0 : i32
    %c0_i32_1 = arith.constant 0 : i32
    return %c0_i32, %c0_i32_0 : i32, i32
  }
  func.func @transform_5(%arg0: i32) -> (i32, i32) {
    %c0_i32 = arith.constant 0 : i32
    %c0_i32_0 = arith.constant 0 : i32
    %c0_i32_1 = arith.constant 0 : i32
    return %c0_i32, %c0_i32_0 : i32, i32
  }
  func.func @transform_6(%arg0: i32) -> i32 {
    %c0_i32 = arith.constant 0 : i32
    %c0_i32_0 = arith.constant 0 : i32
    return %c0_i32 : i32
  }
  func.func @transform_7(%arg0: i32) -> (i32, i32, i32) {
    %c0_i32 = arith.constant 0 : i32
    %c0_i32_0 = arith.constant 0 : i32
    %c0_i32_1 = arith.constant 0 : i32
    return %arg0, %c0_i32, %c0_i32_0 : i32, i32, i32
  }
}

</mosaic_0001>

<bundles_post_ra>
// kernel: tpu_custom_call.1
= control target key start
LH: loop header
LB: loop body
LE: loop exit
PB: predicated region body
PF: predicated region fallthrough
CT: control target
= control target key end

     0   :  { %s1151_s0 = inlined_call_operand.hbm [shape: f32[2,32,256], index: 0, kind: input, shape index: {}]   ;;  %s1152_s1 = inlined_call_operand.vmem [shape: f32[32,2], index: 1, kind: input, shape index: {}]   ;;  %s1153_s2 = inlined_call_operand.vmem [shape: f32[1,2], index: 2, kind: input, shape index: {}]   ;;  %s1154_s3 = inlined_call_operand.vmem [shape: f32[32,2], index: 3, kind: input, shape index: {}]   ;;  %s1155_s4 = inlined_call_operand.vmem [shape: f32[32,1], index: 4, kind: input, shape index: {}]   ;;  %s1156_s5 = inlined_call_operand.vmem [shape: f32[1,32], index: 5, kind: input, shape index: {}]   ;;  %s1157_s6 = inlined_call_operand.<no memory space> [shape: f32[1], index: 6, kind: input, shape index: {}]   ;;  %s1158_s7 = inlined_call_operand.hbm [shape: f32[2,32,256], index: 7, kind: output, shape index: {}]  }
   0x1   :  { %12 = sst [smem:[#allocation2]] %s1157_s6 }
   0x2   :  { %13 = vsyncpa [#allocation4], 0 }
   0x3   :  { %15 = vsyncpa [#allocation4 + $0x1], 0 }
   0x4   :  { %16 = vsyncpa [#allocation5], 0 }
   0x5   :  { %18 = vsyncpa [#allocation5 + $0x1], 0  ;;  %s890_s26 = smov 0   ;;  %s892_s27 = smov 0  }
   0x6   :  { %s894_s28 = smov 0   ;;  %s896_s29 = smov 0  }
   0x7 LB: > { %s911_s6 = sadd.s32 4294967295, %s837_s29   ;;  %s632_s30 = sadd.s32 4294967294, %s837_s29   ;;  %s837_s29 = sphi %s896_s29, %s1171_s29   ;;  %s833_s28 = sphi %s894_s28, %s1170_s28   ;;  %s829_s27 = sphi %s892_s27, %s1169_s27   ;;  %s825_s26 = sphi %s890_s26, %s1168_s26  }
   0x8   : > { %s915_s8 = sadd.s32 1, %s837_s29   ;;  %s31_s9 = sadd.s32 1, %s833_s28 }
   0x9   : > { %s28_s10 = ssub.s32 %s837_s29, %s915_s8  ;;  %p38_p0 = scmp.ne.s32.totalorder %s833_s28, %s829_s27 }
   0xa   : > { %p29_p1 = scmp.eq.s32.totalorder %s28_s10, 0  ;;  %p39_p2 = scmp.eq.s32.totalorder %s837_s29, 0 }
   0xb   : > { %p44_p3 = scmp.ne.s32.totalorder %s829_s27, %s825_s26  ;;  %p45_p4 = scmp.eq.s32.totalorder %s911_s6, 0 }
   0xc   : > { %s927_s11 = scalar_select %p29_p1, %s833_s28, %s31_s9  }
   0xd   : > { %p929_p5 = por %p39_p2, %p38_p0  ;;  %p933_p6 = por %p45_p4, %p44_p3 }
   0xe   : > { %p194_p7 = scmp.eq.s32.totalorder %s911_s6, 1  ;;  %p200_p8 = scmp.eq.s32.totalorder %s632_s30, 1 }
   0xf   : > { %p675_p10 = scmp.lt.s32.totalorder %s837_s29, 2  ;;  %s238_s16 = sand.u32 1, %s833_s28  }
  0x10   : > { %p940_p11 = por %p194_p7, %p38_p0  ;;  %p944_p12 = por %p200_p8, %p44_p3 }
  0x11   : > { %s653_s17 = sshll.u32 %s837_s29, 10  ;;  %s635_s18 = sshll.u32 %s238_s16, 6 }
  0x12   : > { %s1162_s14 = scalar_select %p940_p11, 1, 0 }
  0x13   : > { %s1163_s15 = scalar_select %p944_p12, 1, 0 }
  0x14   : > { %s953_s21 = scalar_lea.hbm %s1151_s0, %s653_s17  ;;  %s242_s22 = scalar_lea.vmem [#allocation3], %s635_s18 }
  0x15   : > { %s249_s23 = sshll.u32 %s242_s22, 4  ;;  %p957_p13 = pnand %p675_p10, %p929_p5  ;;  %s961_s23 = int_to_ptr.vmem [resolvable:$true] %s249_s23 }
  0x16   : > { %s963_s25 = scalar_lea.sflag [#allocation4], %s238_s16  ;;  %s741_s30 = scalar_lea.hbm %s953_s21, 1024 }
  0x17   : > { %p742_p0 = scmp.ne.s32.totalorder %s953_s21, %s741_s30  ;;  %p743_p1 = pneg %p957_p13 }
  0x18   : > { %s746_s12 = scalar_lea.hbm %s1151_s0, 2048  ;;  %p747_p4 = scmp.lt.u32.totalorder %s953_s21, %s1151_s0 }
  0x19   : > { %p744_p2 = pnand %p743_p1, %p742_p0  ;;  %p748_p5 = scmp.lt.u32.totalorder %s746_s12, %s741_s30 }
  0x1a   : > { %p750_p8 = scmp.lt.u32.totalorder %s741_s30, %s953_s21 }
  0x1b   : > { %p745_p3 = pneg %p744_p2  ;;  %p749_p7 = por %p748_p5, %p747_p4 }
  0x1d   : > { %p751_p10 = por %p750_p8, %p749_p7 }
  0x1f   : > { %p752_p9 = pnand %p751_p10, %p745_p3 }
  0x21   : > { %755 = shalt.err (!%p752_p9)
}
  0x22   : > { %s756_s16 = scalar_lea.vmem %s961_s23, 1024  ;;  %s839_s19 = smov [#allocation3]  }
  0x23   : > { %p757_p0 = scmp.ne.s32.totalorder %s961_s23, %s756_s16  ;;  %s761_s20 = sshll.u32 %s839_s19, 4  ;;  %s762_s20 = int_to_ptr.vmem [resolvable:$false] %s761_s20 }
  0x24   : > { %s763_s22 = scalar_lea.vmem %s762_s20, 2048  ;;  %p764_p11 = scmp.lt.s32.totalorder %s961_s23, %s762_s20 }
  0x25   : > { %p759_p2 = pnand %p757_p0, %p743_p1  ;;  %p765_p4 = scmp.lt.s32.totalorder %s763_s22, %s756_s16 }
  0x27   : > { %p760_p12 = pneg %p759_p2  ;;  %p766_p5 = por %p765_p4, %p764_p11 }
  0x29   : > { %p767_p7 = pnand %p766_p5, %p760_p12 }
  0x2b   : > { %770 = shalt.err (!%p767_p7)
}
  0x2c   : > { %s840_s30 = smov 256   ;;  %s841_s9 = smov 16  }
  0x2d   : > { %670 = dma.hbm_to_vmem [thread:$0]  (!%p957_p13), %s953_s21, 1024, %s961_s23, %s963_s25, %s840_s30, %s840_s30, %s841_s9  }
  0x2e   : > { %p638_p9 = scmp.ge.s32.totalorder %s837_s29, 1  ;;  %p257_p1 = scmp.lt.s32.totalorder %s837_s29, 3 }
  0x30   : > { %p258_p3 = pnand %p638_p9, %p257_p1 }
  0x31   : > { %s994_s10 = sand.u32 (!%p258_p3), 1, %s829_s27  }
  0x32   : > { %261 = sbr.rel (%p258_p3) target bundleno = 565 (0x235), region = 48  ;;  %s639_s12 = sshll.u32 (!%p258_p3), %s994_s10, 6 }
  0x33   : > { %s264_s17 = scalar_lea.sflag (!%p258_p3), [#allocation4], %s994_s10  ;;  %s267_s18 = scalar_lea.vmem (!%p258_p3), [#allocation3], %s639_s12 }
  0x39   : > { %816 = dma.done.wait (%p933_p6), %s264_s17, 1024  }
  0x3a   : > { %818 = vsyncadd (%p933_p6), %s264_s17, 4294966272  ;;  %v1004_v0 = vld [vmem:[%s267_s18] sm:$0xff]  ;;  %v1006_v1 = vld [vmem:[%s267_s18 + $0x8] sm:$0xff]  ;;  %v842_v15 = vmov 0.0   ;;  %vm406_vm0 = vcmask 261120   ;;  %vm330_vm1 = vcmask 15360   ;;  %v351_v44 = vlaneseq }
  0x3b   : > { %v1008_v2 = vld [vmem:[%s267_s18 + $0x20] sm:$0xff]  ;;  %v306_v3 = vadd.f32 %v1006_v1, %v1004_v0  ;;  %v1012_v4 = vld [vmem:[%s267_s18 + $0x28] sm:$0xff]  ;;  %v1014_v5 = vld [vmem:[%s267_s18 + $0x10] sm:$0xff]  ;;  %474 = vmatprep.mubr.f32.mxu0 %v842_v15  ;;  %s404_s23 = sld [smem:[#allocation2]]  ;;  %s297_s24 = scalar_lea.vmem [#allocation6], %s639_s12 }
  0x3c   : > { %v1016_v6 = vld [vmem:[%s267_s18 + $0x18] sm:$0xff]  ;;  %v312_v7 = vadd.f32 %v1012_v4, %v1008_v2  ;;  %v1020_v8 = vld [vmem:[%s267_s18 + $0x30] sm:$0xff]  ;;  %v657_v13 = vpack.c.bf16 %v1014_v5, %v1004_v0  ;;  %v403_v17 = vld [vmem:[%s1156_s5] sm:$0x1]  ;;  %v352_v47 = vshrl.u32 %v351_v44, 7  ;;  %s654_s25 = sshll.u32 %s911_s6, 10 }
  0x3d   : > { %v1022_v9 = vld [vmem:[%s267_s18 + $0x38] sm:$0xff]  ;;  %307 = vadd.xlane.f32.xlu0 %v306_v3  ;;  %v309_v10 = vadd.f32 %v1016_v6, %v1014_v5  ;;  %v655_v12 = vpack.c.bf16 %v1016_v6, %v1006_v1  ;;  %v661_v16 = vpack.c.bf16 %v1020_v8, %v1008_v2  ;;  %v322_v21 = vld [vmem:[%s1152_s1] sm:$0xff]  ;;  %v324_v23 = vld [vmem:[%s1152_s1 + $0x10] sm:$0xff]  ;;  %s559_s16 = sshll.u32 %s297_s24, 4  ;;  %s1103_s20 = scalar_lea.hbm %s1158_s7, %s654_s25  ;;  %s1105_s16 = int_to_ptr.vmem [resolvable:$true] %s559_s16 }
  0x3e   : > { %313 = vadd.xlane.f32.xlu1 %v312_v7  ;;  %v315_v11 = vadd.f32 %v1022_v9, %v1020_v8  ;;  %v659_v14 = vpack.c.bf16 %v1022_v9, %v1012_v4  ;;  %v323_v24 = vld [vmem:[%s1152_s1 + $0x8] sm:$0xff]  ;;  %v325_v28 = vld [vmem:[%s1152_s1 + $0x18] sm:$0xff]  ;;  %v344_v48 = vld [vmem:[%s1153_s2] sm:$0x1]  ;;  %v1058_v51 = vsub.s32 0, %v352_v47  ;;  %s546_s6 = scalar_lea.sflag [#allocation5], %s994_s10 }
  0x3f   : > { %656 = vmatprep.subr.bf16.mxu0 %v655_v12  ;;  %v348_v53 = vld [vmem:[%s1154_s3 + $0x8] sm:$0xff]  ;;  %v347_v54 = vld [vmem:[%s1154_s3] sm:$0xff]  ;;  %v350_v56 = vld [vmem:[%s1154_s3 + $0x18] sm:$0xff]  ;;  %s771_s22 = scalar_lea.vmem %s1105_s16, 1024  ;;  %p1165_p11 = scmp.ne.s32.totalorder %s1162_s14, 0 }
  0x40   : > { %658 = vmatpush1.bf16.msra.mxu0 %v657_v13  ;;  %v349_v57 = vld [vmem:[%s1154_s3 + $0x10] sm:$0xff]  ;;  %v372_v13 = vld [vmem:[%s1155_s4 + $0x8] sm:$0xff]  ;;  %p772_p6 = scmp.ne.s32.totalorder %s1105_s16, %s771_s22  ;;  %s844_s30 = smov [#allocation6]  }
  0x41   : > { %310 = vadd.xlane.f32.xlu0 %v309_v10  ;;  %660 = vmatprep.subr.bf16.mxu0 %v659_v14  ;;  %v843_v10 = vmov 0   ;;  %v371_v14 = vld [vmem:[%s1155_s4] sm:$0xff]  ;;  %s775_s9 = sshll.u32 %s844_s30, 4  ;;  %s776_s9 = int_to_ptr.vmem [resolvable:$false] %s775_s9 }
  0x42   : > { %316 = vadd.xlane.f32.xlu1 %v315_v11  ;;  %715 = vset.pattern.permute.xlu0 %v843_v10  ;;  %p773_p12 = pnand %p772_p6, %p1165_p11  ;;  %s777_s17 = scalar_lea.vmem %s776_s9, 2048 }
  0x43   : > { %716 = vset.pattern.permute.xlu1 %v843_v10  ;;  %p778_p8 = scmp.lt.s32.totalorder %s1105_s16, %s776_s9  ;;  %p779_p10 = scmp.lt.s32.totalorder %s777_s17, %s771_s22 }
  0x44   : > { %662 = vmatpush1.bf16.msra.mxu0 %v661_v16  ;;  %p774_p13 = pneg %p773_p12 }
  0x45   : > { %p780_p0 = por %p779_p10, %p778_p8 }
  0x47   : > { %645 = vmatmul.mubr.msk.f32.vlgmr.msra.gmra.mrb[0].mxu0 %vm406_vm0, %v403_v17  ;;  %p781_p2 = pnand %p780_p0, %p774_p13 }
  0xca   : > { %v308_v18 = vpop.xlane.xlu0 %307 }
  0xcb   : > { %v318_v19 = vmul.f32 0.00390625, %v308_v18  ;;  %v314_v20 = vpop.xlane.xlu1 %313 }
  0xcc   : > { %v320_v22 = vmul.f32 0.00390625, %v314_v20  ;;  %v373_v20 = vld [vmem:[%s1155_s4 + $0x10] sm:$0xff] }
  0xcd   : > { %v326_v26 = vmul.f32 %v322_v21, %v318_v19  ;;  %v374_v19 = vld [vmem:[%s1155_s4 + $0x18] sm:$0xff] }
  0xce   : > { %v311_v25 = vpop.xlane.xlu0 %310  ;;  %v328_v31 = vmul.f32 %v324_v23, %v320_v22 }
  0xcf   : > { %v319_v27 = vmul.f32 0.00390625, %v311_v25  ;;  %v317_v29 = vpop.xlane.xlu1 %316  ;;  %v331_v34 = vsel %vm330_vm1, %v326_v26, 0.0 }
  0xd0   : > { %v321_v30 = vmul.f32 0.00390625, %v317_v29  ;;  %v334_v37 = vsel %vm330_vm1, %v328_v31, 0.0 }
  0xd1   : > { %v327_v32 = vmul.f32 %v323_v24, %v319_v27 }
  0xd2   : > { %v329_v33 = vmul.f32 %v325_v28, %v321_v30 }
  0xd3   : > { %v332_v35 = vsel %vm330_vm1, %v327_v32, 0.0 }
  0xd4   : > { %v333_v36 = vadd.f32 %v332_v35, %v331_v34  ;;  %v336_v38 = vsel %vm330_vm1, %v329_v33, 0.0 }
  0xd6   : > { %v335_v39 = vadd.f32 %v334_v37, %v333_v36 }
  0xd8   : > { %v337_v40 = vadd.f32 %v336_v38, %v335_v39 }
  0xda   : > { %v338_v41 = vrot.slane %v337_v40, 4 }
  0xdc   : > { %v339_v42 = vadd.f32 %v338_v41, %v337_v40  ;;  %v405_v41 = vstv %s404_s23 }
  0xde   : > { %v340_v43 = vrot.slane %v339_v42, 2 }
  0xe0   : > { %v341_v45 = vadd.f32 %v340_v43, %v339_v42 }
  0xe2   : > { %v342_v46 = vrot.slane %v341_v45, 1 }
  0xe4   : > { %v343_v49 = vadd.f32 %v342_v46, %v341_v45 }
  0xe6   : > { %v345_v50 = vadd.f32 %v344_v48, %v343_v49 }
  0xe8   : > { %v346_v52 = vmax.f32 %v345_v50, 0.0 }
  0xea   : > { %v354_v55 = vrot.slane %v346_v52, %v1058_v51 }
  0xec   : > { %v356_v58 = vmul.f32 %v354_v55, %v348_v53  ;;  %v355_v59 = vmul.f32 %v354_v55, %v347_v54  ;;  %v358_v62 = vmul.f32 %v354_v55, %v350_v56  ;;  %v357_v63 = vmul.f32 %v354_v55, %v349_v57 }
  0xee   : > { %v362_v60 = vsel %vm330_vm1, %v356_v58, 0.0  ;;  %v359_v61 = vsel %vm330_vm1, %v355_v59, 0.0  ;;  %v368_v3 = vsel %vm330_vm1, %v358_v62, 0.0  ;;  %v365_v7 = vsel %vm330_vm1, %v357_v63, 0.0 }
  0xef   : > { %363 = vadd.xlane.f32.xlu1 %v362_v60  ;;  %360 = vadd.xlane.f32.xlu0 %v359_v61 }
  0xf3   : > { %369 = vadd.xlane.f32.xlu1 %v368_v3  ;;  %366 = vadd.xlane.f32.xlu0 %v365_v7 }
 0x11a   : > { %v476_v11 = vpop.f32.mrb[0].mxu0 }
 0x11b   : > { %v478_v12 = vpop.f32.mrb[1].mxu0  ;;  %v477_v42 = vadd.f32 %v476_v11, %v405_v41 }
 0x11c   : > { %v479_v43 = vadd.f32 %v478_v12, %v405_v41 }
 0x11d   : > { %v646_v44 = vmul.f32 -1.442695, %v477_v42 }
 0x11e   : > { %v647_v45 = vmul.f32 -1.442695, %v479_v43 }
 0x17c   : > { %v364_v15 = vpop.xlane.xlu1 %363  ;;  %v361_v16 = vpop.xlane.xlu0 %360 }
 0x17d   : > { %v376_v17 = vadd.f32 %v372_v13, %v364_v15  ;;  %v375_v18 = vadd.f32 %v371_v14, %v361_v16 }
 0x17f   : > { %v642_v21 = vmul.f32 -1.442695, %v376_v17  ;;  %v641_v22 = vmul.f32 -1.442695, %v375_v18 }
 0x180   : > { %v370_v23 = vpop.xlane.xlu1 %369  ;;  %v367_v24 = vpop.xlane.xlu0 %366 }
 0x181   : > { %717 = vpow2.f32 %v642_v21  ;;  %v378_v25 = vadd.f32 %v374_v19, %v370_v23  ;;  %v377_v26 = vadd.f32 %v373_v20, %v367_v24 }
 0x182   : > { %719 = vpow2.f32 %v641_v22 }
 0x183   : > { %v644_v27 = vmul.f32 -1.442695, %v378_v25  ;;  %v643_v28 = vmul.f32 -1.442695, %v377_v26 }
 0x185   : > { %721 = vpow2.f32 %v644_v27 }
 0x186   : > { %723 = vpow2.f32 %v643_v28 }
 0x18b   : > { %v718_v29 = vpop.eup %717 }
 0x18c   : > { %v720_v30 = vpop.eup %719  ;;  %v392_v31 = vadd.f32 1.0, %v718_v29 }
 0x18d   : > { %v391_v32 = vadd.f32 1.0, %v720_v30 }
 0x18e   : > { %725 = vrcp.f32 %v392_v31 }
 0x18f   : > { %v722_v33 = vpop.eup %721  ;;  %727 = vrcp.f32 %v391_v32 }
 0x190   : > { %v724_v34 = vpop.eup %723  ;;  %v394_v36 = vadd.f32 1.0, %v722_v33 }
 0x191   : > { %v393_v35 = vadd.f32 1.0, %v724_v34 }
 0x193   : > { %729 = vrcp.f32 %v393_v35 }
 0x194   : > { %731 = vrcp.f32 %v394_v36 }
 0x195   : > { %733 = vpow2.f32 %v646_v44 }
 0x196   : > { %735 = vpow2.f32 %v647_v45 }
 0x198   : > { %v726_v37 = vpop.eup %725 }
 0x199   : > { %v728_v38 = vpop.eup %727  ;;  %500 = vperm.xlu1 %716, %v726_v37  }
 0x19a   : > { %495 = vperm.xlu0 %715, %v728_v38  }
 0x19d   : > { %v730_v39 = vpop.eup %729 }
 0x19e   : > { %505 = vperm.xlu1 %716, %v730_v39   ;;  %v732_v40 = vpop.eup %731 }
 0x19f   : > { %v734_v46 = vpop.eup %733 }
 0x1a0   : > { %v736_v47 = vpop.eup %735  ;;  %v487_v48 = vadd.f32 1.0, %v734_v46 }
 0x1a1   : > { %v488_v49 = vadd.f32 1.0, %v736_v47 }
 0x1a2   : > { %510 = vperm.xlu1 %716, %v732_v40   ;;  %737 = vrcp.f32 %v487_v48 }
 0x1a3   : > { %739 = vrcp.f32 %v488_v49 }
 0x1ac   : > { %v738_v50 = vpop.eup %737 }
 0x1ad   : > { %v740_v52 = vpop.eup %739  ;;  %v516_v53 = vrot.slane %v738_v50, %v1058_v51 }
 0x1ae   : > { %v520_v54 = vrot.slane %v740_v52, %v1058_v51 }
 0x218   : > { %v501_v55 = vpop.permute.xlu1 %500 }
 0x219   : > { %v523_v56 = vadd.f32 %v516_v53, %v501_v55  ;;  %v524_v57 = vadd.f32 %v520_v54, %v501_v55  ;;  %v496_v58 = vpop.permute.xlu0 %495 }
 0x21a   : > { %v521_v59 = vadd.f32 %v516_v53, %v496_v58  ;;  %v522_v60 = vadd.f32 %v520_v54, %v496_v58 }
 0x21b   : > { %v531_v61 = vmul.f32 %v523_v56, %v1014_v5  ;;  %v532_v62 = vmul.f32 %v524_v57, %v1016_v6 }
 0x21c   : > { %v529_v63 = vmul.f32 %v521_v59, %v1004_v0  ;;  %v530_v3 = vmul.f32 %v522_v60, %v1006_v1 }
 0x21d   : > { %539 = vst [vmem:[%s297_s24 + $0x10] sm:$0xff] %v531_v61  ;;  %540 = vst [vmem:[%s297_s24 + $0x18] sm:$0xff] %v532_v62  ;;  %v506_v51 = vpop.permute.xlu1 %505 }
 0x21e   : > { %537 = vst [vmem:[%s297_s24] sm:$0xff] %v529_v63  ;;  %538 = vst [vmem:[%s297_s24 + $0x8] sm:$0xff] %v530_v3  ;;  %v525_v7 = vadd.f32 %v516_v53, %v506_v51  ;;  %v526_v10 = vadd.f32 %v520_v54, %v506_v51 }
 0x220   : > { %v533_v11 = vmul.f32 %v525_v7, %v1008_v2  ;;  %v534_v5 = vmul.f32 %v526_v10, %v1012_v4 }
 0x221   : > { %v511_v0 = vpop.permute.xlu1 %510 }
 0x222   : > { %541 = vst [vmem:[%s297_s24 + $0x20] sm:$0xff] %v533_v11  ;;  %542 = vst [vmem:[%s297_s24 + $0x28] sm:$0xff] %v534_v5  ;;  %v527_v1 = vadd.f32 %v516_v53, %v511_v0  ;;  %v528_v6 = vadd.f32 %v520_v54, %v511_v0 }
 0x224   : > { %v535_v2 = vmul.f32 %v527_v1, %v1020_v8  ;;  %v536_v4 = vmul.f32 %v528_v6, %v1022_v9 }
 0x226   : > { %543 = vst [vmem:[%s297_s24 + $0x30] sm:$0xff] %v535_v2  ;;  %544 = vst [vmem:[%s297_s24 + $0x38] sm:$0xff] %v536_v4 }
 0x227   : > { %784 = shalt.err (!%p781_p2)
}
 0x228   : > { %s785_s18 = scalar_lea.hbm %s1103_s20, 1024  ;;  %s789_s23 = scalar_lea.hbm %s1158_s7, 2048 }
 0x229   : > { %p786_p4 = scmp.ne.s32.totalorder %s1103_s20, %s785_s18  ;;  %p790_p9 = scmp.lt.u32.totalorder %s1103_s20, %s1158_s7 }
 0x22a   : > { %p791_p1 = scmp.lt.u32.totalorder %s789_s23, %s785_s18  ;;  %p793_p6 = scmp.lt.u32.totalorder %s785_s18, %s1103_s20 }
 0x22b   : > { %p787_p5 = pnand %p786_p4, %p1165_p11 }
 0x22c   : > { %p792_p3 = por %p791_p1, %p790_p9 }
 0x22d   : > { %p788_p7 = pneg %p787_p5 }
 0x22e   : > { %p794_p12 = por %p793_p6, %p792_p3 }
 0x230   : > { %p795_p13 = pnand %p794_p12, %p788_p7 }
 0x232   : > { %798 = shalt.err (!%p795_p13)
}
 0x233   : > { %s845_s12 = smov 256   ;;  %s846_s19 = smov 16  }
 0x234   : > { %665 = dma.vmem_to_hbm [thread:$0]  (%p1165_p11), %s1105_s16, 1024, %s1103_s20, %s546_s6, %s845_s12, %s845_s12, %s846_s19  }
 0x235 PF: > { %s574_s22 = sand.u32 1, %s825_s26   ;;  %p1166_p8 = scmp.ne.s32.totalorder %s1163_s15, 0 }
 0x236   : > { %p1167_p10 = scmp.ge.s32.totalorder %s837_s29, 2  ;;  %s575_s30 = scalar_lea.sflag [#allocation5], %s574_s22 }
 0x238   : > { %p672_p0 = pnand %p1167_p10, %p1166_p8 }
 0x23a   : > { %820 = dma.done.wait (!%p672_p0), %s575_s30, 1024  }
 0x23b   : > { %822 = vsyncadd (!%p672_p0), %s575_s30, 4294966272  ;;  %p21_p2 = scmp.ge.s32.totalorder %s915_s8, 4   ;;  %s1168_s26 = smov %s829_s27 }
 0x23c   : > { %s1169_s27 = smov %s833_s28  ;;  %s1170_s28 = smov %s927_s11 }
 0x23d   : > { %s1171_s29 = smov %s915_s8  ;;  %23 = sbr.rel (!%p21_p2) target bundleno = 7 (0x7), region = 93 }
 0x244   :  { %580 = vsyncpa [#allocation4], 1 }
 0x245   :  { %582 = vsyncpa [#allocation4 + $0x1], 1 }
 0x246   :  { %583 = vsyncpa [#allocation5], 1 }
 0x247   :  { %585 = vsyncpa [#allocation5 + $0x1], 1 }

</bundles_post_ra>
